<compile_context>
chip_gen: v7x
topology: tpu7x:2x2x1
jax: 0.10.0
libtpu: 0.0.40
codegen_flags: <defaults>
</compile_context>

<pallas_src>
import functools

import numpy as np
import jax
import jax.numpy as jnp
from jax.experimental import pallas as pl
from jax.experimental.pallas import tpu as pltpu


def level_kernel(alpha_ref, x_ref, proj_ref, smooth_ref, o_ref, *, mm_dtype):
    """One batch-block per grid step.

    alpha_ref  : SMEM (1,)        alpha = sigmoid(alpha_param)
    x_ref      : VMEM (N, bb*TF)  time-major, lane-packed x
    proj_ref   : VMEM (N, bb*TF)  time-major, lane-packed fused projection
                                  lg@Wg - alpha*(lp@Wp) + (bg - alpha*bp)
    smooth_ref : VMEM (N, N)      lower-triangular (1-alpha)^(i-j) matrix
                                  (constant index_map -> resident across steps)
    o_ref      : VMEM (N, bb*TF)
    """
    alpha = alpha_ref[0]
    s = alpha * x_ref[...] + proj_ref[...]                       # f32
    o_ref[...] = jnp.dot(smooth_ref[...], s.astype(mm_dtype),
                         preferred_element_type=jnp.float32)


def _pick_batch_block(B, TF, target_blocks=4):
    """Largest grid (up to target_blocks steps) whose per-step lane width bb*TF
    stays a multiple of 128 (lane-dense stores, DMA/compute overlap, megacore
    sharding).  Falls back to a single whole-batch step otherwise."""
    if (B * TF) % 128 != 0:
        return B
    for nb in range(min(target_blocks, B), 1, -1):
        if B % nb == 0 and ((B // nb) * TF) % 128 == 0:
            return B // nb
    return B


def level_forward(x, latent_growth, latent_period, alpha_param,
                  w_growth, b_growth, w_period, b_period,
                  *, batch_block=None, matmul_dtype=jnp.bfloat16):
    f32 = jnp.float32
    B, N, TF = x.shape

    # ---- scalar smoothing factor (f32, NaN-safe at alpha -> 1) ----
    alpha = jax.nn.sigmoid(alpha_param.astype(f32).reshape(()))
    logq = jnp.log(jnp.maximum(1.0 - alpha, jnp.finfo(f32).tiny))

    # ---- fused projection, hoisted to the wrapper (one XLA batched matmul) ----
    #   proj = lg@Wg - alpha*(lp@Wp) + (bg - alpha*bp)
    lgp = jnp.concatenate([latent_growth, latent_period], axis=-1).astype(f32)   # (B,N,2D)
    w_fused = jnp.concatenate(
        [w_growth.astype(f32), -alpha * w_period.astype(f32)], axis=0)           # (2D,TF)
    b_fused = b_growth.astype(f32) - alpha * b_period.astype(f32)                # (TF,)
    proj = jnp.matmul(lgp, w_fused) + b_fused                                    # (B,N,TF)

    # ---- time-major lane-packed slabs (N, B*TF) (layout plumbing only) ----
    # TODO(synk): if xprof shows these repacks not fusing with their producers,
    # produce x / the latents time-major upstream instead.
    x_t = jnp.transpose(x.astype(f32), (1, 0, 2)).reshape(N, B * TF)
    proj_t = jnp.transpose(proj, (1, 0, 2)).reshape(N, B * TF)

    # ---- lower-triangular exponential smoothing matrix, built ONCE ----
    # smooth[i, j] = (1-alpha)^(i-j) for j <= i, else 0.
    row = jnp.arange(N, dtype=jnp.int32)[:, None]
    col = jnp.arange(N, dtype=jnp.int32)[None, :]
    diff = jnp.maximum(row - col, 0).astype(f32)
    smooth = jnp.where(row >= col, jnp.exp(diff * logq), 0.0).astype(matmul_dtype)

    # ---- grid over batch-blocks ----
    bb = _pick_batch_block(B, TF) if batch_block is None else batch_block
    assert B % bb == 0
    num_blocks = B // bb

    alpha_smem = alpha.reshape(1)   # (1,) f32 scalar on the scalar path (SMEM)

    # VMEM budget: resident smooth (double-buffered by default) + double-buffered
    # x/proj/out blocks + kernel temporaries, with generous headroom.
    mm_bytes = np.dtype(matmul_dtype).itemsize
    slab_block_bytes = N * bb * TF * 4
    needed = 2 * N * N * mm_bytes + (3 * 2 + 4) * slab_block_bytes
    vmem_limit = int(min(max(2 * needed, 32 << 20), 128 << 20))

    kernel = functools.partial(level_kernel, mm_dtype=matmul_dtype)

    out_t = pl.pallas_call(
        kernel,
        out_shape=jax.ShapeDtypeStruct((N, B * TF), f32),
        grid=(num_blocks,),
        in_specs=[
            pl.BlockSpec(memory_space=pltpu.MemorySpace.SMEM),     # alpha scalar
            pl.BlockSpec((N, bb * TF), lambda g: (0, g)),          # x slab
            pl.BlockSpec((N, bb * TF), lambda g: (0, g)),          # proj slab
            # Constant block index -> fetched once, resident across grid steps.
            pl.BlockSpec((N, N), lambda g: (0, 0)),                # smoothing matrix
        ],
        out_specs=pl.BlockSpec((N, bb * TF), lambda g: (0, g)),
        compiler_params=pltpu.CompilerParams(
            dimension_semantics=("parallel",),
            vmem_limit_bytes=vmem_limit),
        cost_estimate=pl.CostEstimate(
            flops=2 * N * N * B * TF + 2 * N * B * TF,
            transcendentals=0,
            bytes_accessed=3 * N * B * TF * 4 + N * N * mm_bytes),
    )(alpha_smem, x_t, proj_t, smooth)

    # (N, B*TF) -> (B, N, TF)
    return jnp.transpose(out_t.reshape(N, B, TF), (1, 0, 2))


# ---------------- pure-numpy reference (mirrors the torch code) ----------------

def _conv1d_fft_np(values, weights):
    # values: (B, N, C), weights: (M,)  -- replicates torch conv1d_fft
    N = values.shape[-2]
    M = weights.shape[-1]
    L = N + M - 1  # any length >= N+M-1 gives identical selected output
    f_v = np.fft.rfft(values, n=L, axis=-2)
    f_w = np.fft.rfft(weights, n=L, axis=-1)
    f_vw = f_v * np.conj(f_w)[..., None]
    out = np.fft.irfft(f_vw, L, axis=-2)
    out = np.roll(out, -1, axis=-2)
    return out[..., L - N:, :]


def level_ref_np(x, lg, lp, alpha_param, wg, bg, wp, bp):
    alpha = 1.0 / (1.0 + np.exp(-float(alpha_param[0])))
    n = x.shape[1]
    powers = np.arange(n)[::-1].astype(np.float64)

    periodicity = lp @ wp + bp
    periodicity_weights = alpha * (1.0 - alpha) ** powers
    periodicity_term = _conv1d_fft_np(x - periodicity, periodicity_weights)

    growth = lg @ wg + bg
    growth_weights = (1.0 - alpha) ** powers
    growth_term = _conv1d_fft_np(growth, growth_weights)
    return periodicity_term + growth_term


if __name__ == "__main__":
    def run_case(key, B, N, D, TF, matmul_dtype, rtol, atol):
        k1, k2, k3, k4, k5, k6, k7 = jax.random.split(key, 7)
        x = jax.random.normal(k1, (B, N, TF), jnp.float32)
        lg = jax.random.normal(k2, (B, N, D), jnp.float32)
        lp = jax.random.normal(k3, (B, N, D), jnp.float32)
        alpha_param = jnp.array([0.0], jnp.float32)   # nn.Parameter(torch.Tensor([0.0]))
        bound = 1.0 / np.sqrt(D)
        wg = jax.random.uniform(k4, (D, TF), jnp.float32, -bound, bound)
        bg = jax.random.uniform(k5, (TF,), jnp.float32, -bound, bound)
        wp = jax.random.uniform(k6, (D, TF), jnp.float32, -bound, bound)
        bp = jax.random.uniform(k7, (TF,), jnp.float32, -bound, bound)

        fwd = jax.jit(level_forward, static_argnames=("batch_block", "matmul_dtype"))
        out = jax.block_until_ready(
            fwd(x, lg, lp, alpha_param, wg, bg, wp, bp, matmul_dtype=matmul_dtype))

        ref = level_ref_np(
            np.asarray(x, np.float64), np.asarray(lg, np.float64),
            np.asarray(lp, np.float64), np.asarray(alpha_param, np.float64),
            np.asarray(wg, np.float64), np.asarray(bg, np.float64),
            np.asarray(wp, np.float64), np.asarray(bp, np.float64))
        np.testing.assert_allclose(np.asarray(out, np.float64), ref, rtol=rtol, atol=atol)

    root = jax.random.PRNGKey(0)
    k_a, k_b = jax.random.split(root)

    # Tiny shapes, single grid step, f32 MXU operands: tight tolerance.
    run_case(k_a, B=2, N=16, D=32, TF=4, matmul_dtype=jnp.float32, rtol=1e-2, atol=1e-3)
    # Same shapes with bf16 MXU operands (the default fast path).
    run_case(k_a, B=2, N=16, D=32, TF=4, matmul_dtype=jnp.bfloat16, rtol=3e-2, atol=3e-2)
    # Lane-dense multi-block grid (bb*TF = 128, 2 steps): exercises the
    # pipelined / megacore-shardable path with the resident smoothing matrix.
    run_case(k_b, B=64, N=16, D=8, TF=4, matmul_dtype=jnp.bfloat16, rtol=3e-2, atol=3e-2)

    print("KERNEL_OK")
</pallas_src>

<mosaic_0001>
module attributes {stable_mosaic.version = 11 : i64} {
  func.func @level_kernel(%arg0: i32, %arg1: memref<1xf32, #tpu.memory_space<smem>>, %arg2: memref<16x8xf32, #tpu.memory_space<vmem>>, %arg3: memref<16x8xf32, #tpu.memory_space<vmem>>, %arg4: memref<16x16xf32, #tpu.memory_space<vmem>>, %arg5: memref<16x8xf32, #tpu.memory_space<vmem>>) attributes {dimension_semantics = [#tpu.dimension_semantics<parallel>], iteration_bounds = array<i64: 1>, scalar_prefetch = 0 : i64, scratch_operands = 0 : i64, tpu.core_type = #tpu.core_type<tc>, window_params = [{transform_indices = @transform_0, window_bounds = array<i64: 1>}, {transform_indices = @transform_1, window_bounds = array<i64: 16, 8>}, {transform_indices = @transform_2, window_bounds = array<i64: 16, 8>}, {pipeline_mode = #tpu.pipeline_mode<synchronous>, transform_indices = @transform_3, window_bounds = array<i64: 16, 16>}, {transform_indices = @transform_4, window_bounds = array<i64: 16, 8>}]} {
    %c0 = arith.constant 0 : index
    %0 = memref.load %arg1[%c0] : memref<1xf32, #tpu.memory_space<smem>>
    %c0_0 = arith.constant 0 : index
    %c0_1 = arith.constant 0 : index
    %1 = vector.load %arg2[%c0_0, %c0_1] : memref<16x8xf32, #tpu.memory_space<vmem>>, vector<16x8xf32>
    %2 = vector.broadcast %0 : f32 to vector<16x8xf32>
    %3 = arith.mulf %2, %1 : vector<16x8xf32>
    %c0_2 = arith.constant 0 : index
    %c0_3 = arith.constant 0 : index
    %4 = vector.load %arg3[%c0_2, %c0_3] : memref<16x8xf32, #tpu.memory_space<vmem>>, vector<16x8xf32>
    %5 = arith.addf %3, %4 : vector<16x8xf32>
    %c0_4 = arith.constant 0 : index
    %c0_5 = arith.constant 0 : index
    %6 = vector.load %arg4[%c0_4, %c0_5] : memref<16x16xf32, #tpu.memory_space<vmem>>, vector<16x16xf32>
    %cst = arith.constant dense<0.000000e+00> : vector<16x8xf32>
    %7 = tpu.matmul %6, %5, %cst {dimension_numbers = #tpu.dot_dimension_numbers<[1], [0], [0], [1], [0, 0, 1, 1], [], []>} : vector<16x16xf32>, vector<16x8xf32>, vector<16x8xf32> -> vector<16x8xf32>
    %c0_6 = arith.constant 0 : index
    %c0_7 = arith.constant 0 : index
    %8 = vector.load %arg5[%c0_6, %c0_7] : memref<16x8xf32, #tpu.memory_space<vmem>>, vector<16x8xf32>
    tpu.vector_store %arg5[%c0_6, %c0_7], %7 {strides = array<i32>} : memref<16x8xf32, #tpu.memory_space<vmem>>, vector<16x8xf32>,
    return
  }
  func.func @transform_0(%arg0: i32) -> i32 {
    %c0_i32 = arith.constant 0 : i32
    %c0_i32_0 = arith.constant 0 : i32
    return %c0_i32 : i32
  }
  func.func @transform_1(%arg0: i32) -> (i32, i32) {
    %c0_i32 = arith.constant 0 : i32
    %c0_i32_0 = arith.constant 0 : i32
    return %c0_i32, %arg0 : i32, i32
  }
  func.func @transform_2(%arg0: i32) -> (i32, i32) {
    %c0_i32 = arith.constant 0 : i32
    %c0_i32_0 = arith.constant 0 : i32
    return %c0_i32, %arg0 : i32, i32
  }
  func.func @transform_3(%arg0: i32) -> (i32, i32) {
    %c0_i32 = arith.constant 0 : i32
    %c0_i32_0 = arith.constant 0 : i32
    %c0_i32_1 = arith.constant 0 : i32
    return %c0_i32, %c0_i32_0 : i32, i32
  }
  func.func @transform_4(%arg0: i32) -> (i32, i32) {
    %c0_i32 = arith.constant 0 : i32
    %c0_i32_0 = arith.constant 0 : i32
    return %c0_i32, %arg0 : i32, i32
  }
}

</mosaic_0001>

<bundles_post_ra>
// kernel: level_forward.1
= control target key start
LH: loop header
LB: loop body
LE: loop exit
PB: predicated region body
PF: predicated region fallthrough
CT: control target
= control target key end

     0   :  { %vm30_vm0 = vcmask 130048   ;;  %vm112_vm1 = vcmask 64512   ;;  %s190_s0 = inlined_call_operand.<no memory space> [shape: f32[1], index: 0, kind: input, shape index: {}]   ;;  %s191_s1 = inlined_call_operand.vmem [shape: f32[16,8], index: 1, kind: input, shape index: {}]   ;;  %s192_s2 = inlined_call_operand.vmem [shape: f32[16,8], index: 2, kind: input, shape index: {}]   ;;  %s193_s3 = inlined_call_operand.vmem [shape: f32[16,16], index: 3, kind: input, shape index: {}]   ;;  %s194_s4 = inlined_call_operand.vmem [shape: f32[16,8], index: 4, kind: output, shape index: {}]  }
   0x1   :  { %v19_v0 = vld [vmem:[%s191_s1] sm:$0xff]  ;;  %v20_v1 = vld [vmem:[%s191_s1 + $0x8] sm:$0xff]  ;;  %v21_v2 = vstv %s190_s0 }
   0x2   :  { %v24_v3 = vld [vmem:[%s192_s2] sm:$0xff]  ;;  %v22_v4 = vmul.f32 %v21_v2, %v19_v0  ;;  %v23_v5 = vmul.f32 %v21_v2, %v20_v1  ;;  %v25_v6 = vld [vmem:[%s192_s2 + $0x8] sm:$0xff] }
   0x3   :  { %v28_v7 = vld [vmem:[%s193_s3] sm:$0xff]  ;;  %v29_v11 = vld [vmem:[%s193_s3 + $0x8] sm:$0xff] }
   0x4   :  { %129 = vmatprep.mubr.msk.f32.mxu0 %vm30_vm0, %v28_v7  ;;  %v26_v8 = vadd.f32 %v24_v3, %v22_v4  ;;  %v27_v9 = vadd.f32 %v25_v6, %v23_v5 }
   0x6   :  { %v132_v10 = vpack.c.bf16 %v27_v9, %v26_v8 }
   0x8   :  { %133 = vmatprep.subr.bf16.mxu0 %v132_v10 }
   0x9   :  { %135 = vmatpush3.bf16.msra.mxu0 %v132_v10 }
   0xc   :  { %130 = vmatmul.mubr.msk.f32.vlgmr.msra.gmra.mrb[0].mxu0 %vm30_vm0, %v29_v11 }
  0xdf   :  { %v131_v12 = vpop.f32.mrb[0].mxu0 }
  0xe0   :  { %114 = vst.msk [vmem:[%s194_s4 + $0x8] sm:$0xff] %vm112_vm1, %v131_v12  ;;  %v103_v13 = vpop.f32.mrb[1].mxu0 }
  0xe1   :  { %113 = vst.msk [vmem:[%s194_s4] sm:$0xff] %vm112_vm1, %v103_v13 }

</bundles_post_ra>
